<compile_context>
chip_gen: v6e
topology: v6e:2x2x1
jax: 0.10.0
libtpu: 0.0.40
codegen_flags: <defaults>
</compile_context>

<pallas_src>
import functools

import jax
import jax.numpy as jnp
from jax.experimental import pallas as pl
from jax.experimental.pallas import tpu as pltpu


def _round_up(x, m):
    return ((x + m - 1) // m) * m


# ----------------------------------------------------------------------------
# Pallas kernel: packed 3-layer MLP, features block-diagonal along lanes,
# gate z folded into the last layer, lane-dense (O, tb) output.
# ----------------------------------------------------------------------------
def nam_packed_kernel(x_ref, w1_ref, b1_ref, w2_ref, b2_ref, w3t_ref, b3t_ref,
                      o_ref):
    h = jnp.dot(x_ref[...], w1_ref[...],
                preferred_element_type=jnp.float32) + b1_ref[...]   # (TB, F*H)
    h = jnp.maximum(h, 0.0)
    h = jnp.dot(h.astype(w2_ref.dtype), w2_ref[...],
                preferred_element_type=jnp.float32) + b2_ref[...]   # (TB, F*H)
    h = jnp.maximum(h, 0.0)
    # Lane-dense output: (O, TB) = W3z^T(O,FH) x h(TB,FH)^T  (rhs contracted
    # on its last dim -> single unmasked lane-wide store per step).
    out_t = jax.lax.dot_general(
        w3t_ref[...], h.astype(w3t_ref.dtype),
        dimension_numbers=(((1,), (1,)), ((), ())),
        preferred_element_type=jnp.float32) + b3t_ref[...]          # (O, TB)
    o_ref[...] = out_t.astype(o_ref.dtype)


def nam_forward_pallas(x_emb, w1, b1, w2, b2, w3, b3, z_smooth, *,
                       compute_dtype=jnp.bfloat16, batch_tile=4096,
                       vmem_limit_bytes=32 * 1024 * 1024):
    """x_emb: (B, F, E) float32; returns (B, n_output) float32.

    compute_dtype: bfloat16 by default (halves x/weight DMA traffic, matches
    the MXU's native bf16 rate; accumulation stays f32).  Pass jnp.float32 for
    a bit-tight match with an f32 reference.
    """
    B, F, E = x_emb.shape
    H = w1.shape[-1]
    O = w3.shape[-1]
    FE, FH = F * E, F * H

    # --- pack features along the lane dimension (wrapper-side, once) --------
    x_cat = x_emb.reshape(B, FE)                      # free contiguous reshape
    eye = jnp.eye(F, dtype=jnp.float32)
    w1_bd = jnp.einsum('fab,fg->fagb', w1, eye).reshape(FE, FH)
    w2_bd = jnp.einsum('fab,fg->fagb', w2, eye).reshape(FH, FH)
    # fold smooth gate z into the output layer; keep W3 transposed (O, F*H)
    # so the kernel's final matmul is lane-dense.
    w3t_z = (w3 * z_smooth[:, None, None]).reshape(FH, O).T          # (O, FH)
    b3t_z = (b3 * z_smooth[:, None]).sum(axis=0).reshape(O, 1)       # (O, 1)
    b1_cat = b1.reshape(1, FH)
    b2_cat = b2.reshape(1, FH)

    # --- batch tiling ---------------------------------------------------------
    itemsize = jnp.dtype(compute_dtype).itemsize
    sub = 8 * max(1, 4 // itemsize)           # 8 (f32) / 16 (bf16) / 32 (8-bit)
    B_pad = _round_up(max(B, sub), sub)

    assert batch_tile % 128 == 0, "batch_tile must be a multiple of 128"
    if B_pad > batch_tile:
        tb = batch_tile
    elif B_pad >= 2048:
        # Split into >= 2 steps so the "parallel" axis shards across both of
        # v7x's TensorCores (no-op on v5e/v6e).
        tb = _round_up(-(-B_pad // 2), 128)
    else:
        tb = B_pad                            # single full-extent block

    # --- VMEM budget (double-buffered, lane-padded); clamp tb if needed ------
    fe_pad = _round_up(FE, 128)
    fh_pad = _round_up(FH, 128)

    def step_bytes(t):
        return (2 * t * fe_pad * itemsize                 # x (double-buffered)
                + 2 * _round_up(O, 8) * t * 4             # out (double-buffered)
                + 2 * t * fh_pad * 4                      # h1/h2 f32 temporaries
                + (fe_pad * fh_pad + fh_pad * fh_pad + O * fh_pad) * itemsize
                + (2 * fh_pad + O) * 4)                   # biases

    while step_bytes(tb) > int(0.75 * vmem_limit_bytes) and tb > 128:
        tb = max(128, (tb // 2) // 128 * 128)

    B_pad = _round_up(B_pad, tb)
    if B_pad != B:
        # Padded rows are zeros; their (bias-driven) outputs are sliced off
        # below — never reduce over the padded output buffer directly.
        x_cat = jnp.pad(x_cat, ((0, B_pad - B), (0, 0)))

    # compute-dtype cast (biases stay f32; added after the f32 accumulation)
    xc = x_cat.astype(compute_dtype)
    w1c = w1_bd.astype(compute_dtype)
    w2c = w2_bd.astype(compute_dtype)
    w3tc = w3t_z.astype(compute_dtype)

    flops = 2 * B_pad * (FE * FH + FH * FH + FH * O)
    bytes_accessed = (B_pad * FE * itemsize
                      + (FE * FH + FH * FH + O * FH) * itemsize
                      + (2 * FH + O) * 4
                      + O * B_pad * 4)

    out_t = pl.pallas_call(
        nam_packed_kernel,
        out_shape=jax.ShapeDtypeStruct((O, B_pad), jnp.float32),
        grid=(B_pad // tb,),
        in_specs=[
            pl.BlockSpec((tb, FE), lambda i: (i, 0)),      # x (batch-tiled)
            pl.BlockSpec((FE, FH), lambda i: (0, 0)),      # W1 block-diag
            pl.BlockSpec((1, FH), lambda i: (0, 0)),       # b1
            pl.BlockSpec((FH, FH), lambda i: (0, 0)),      # W2 block-diag
            pl.BlockSpec((1, FH), lambda i: (0, 0)),       # b2
            pl.BlockSpec((O, FH), lambda i: (0, 0)),       # W3^T (z folded)
            pl.BlockSpec((O, 1), lambda i: (0, 0)),        # b3 (z folded)
        ],
        out_specs=pl.BlockSpec((O, tb), lambda i: (0, i)),  # lane-dense store
        compiler_params=pltpu.CompilerParams(
            dimension_semantics=("parallel",),
            vmem_limit_bytes=vmem_limit_bytes),
        cost_estimate=pl.CostEstimate(flops=flops, transcendentals=0,
                                      bytes_accessed=bytes_accessed),
    )(xc, w1c, b1_cat, w2c, b2_cat, w3tc, b3t_z)

    return out_t[:, :B].T                                   # (B, O)


# ----------------------------------------------------------------------------
# Plain-JAX glue: smooth gate + embedding gather with Gaussian bin smoothing.
# (data-dependent gather; fuses into one XLA fusion under jit)
# ----------------------------------------------------------------------------
def get_smooth_z(z, gamma):
    smooth = -2.0 / gamma ** 3 * z ** 3 + 3.0 / (2.0 * gamma) * z + 0.5
    return jnp.where(z <= -gamma / 2.0, 0.0,
                     jnp.where(z >= gamma / 2.0, 1.0, smooth))


def embed_mains(mains, embedding, feature_offsets, feature_sizes,
                total_feature_size, kernel_size, kernel_weight):
    """mains: (B, F) int32 bin indices; returns (B, F, n_embed) float32."""
    idx = mains + feature_offsets[None, :]                        # (B, F)
    offs = jnp.arange(-kernel_size, kernel_size + 1)              # (K,)
    idx_k = idx[..., None] + offs                                 # (B, F, K)
    w = jnp.exp(-jnp.square(offs).astype(jnp.float32)
                / (2.0 * kernel_weight))                          # (K,)
    lo = feature_offsets.reshape(1, -1, 1)
    hi = lo + feature_sizes.reshape(1, -1, 1)
    w = jnp.where((idx_k < lo) | (idx_k >= hi), 0.0, w)           # (B, F, K)
    emb = embedding[jnp.clip(idx_k, 0, total_feature_size - 1)]   # (B, F, K, E)
    return jnp.sum(emb * w[..., None], axis=2)                    # (B, F, E)


def nam_forward_reference(x_emb, w1, b1, w2, b2, w3, b3, z_smooth):
    h = jnp.einsum('ijk,jkl->ijl', x_emb, w1) + b1
    h = jax.nn.relu(h)
    h = jnp.einsum('ijk,jkl->ijl', h, w2) + b2
    h = jax.nn.relu(h)
    o = jnp.einsum('ijk,jkl->ijl', h, w3) + b3
    return jnp.einsum('ijk,j->ik', o, z_smooth)


# ----------------------------------------------------------------------------
# Main: deterministic parameter init (shapes per DiscreteNAM.__init__) + run.
# ----------------------------------------------------------------------------
if __name__ == "__main__":
    n_features = 4
    feature_sizes = [5, 7, 3, 6]
    n_embed = 8
    n_hidden = 32          # F * H = 128 -> exactly one 128-lane group
    n_output = 1
    gamma = 1.0
    kernel_size = 1
    kernel_weight = 1.0
    batch = 8

    total_feature_size = sum(feature_sizes)
    feature_sizes_arr = jnp.array(feature_sizes, dtype=jnp.int32)
    feature_offsets = jnp.concatenate(
        [jnp.zeros((1,), jnp.int32),
         jnp.cumsum(feature_sizes_arr)[:-1]]).astype(jnp.int32)

    key = jax.random.PRNGKey(0)
    ks = jax.random.split(key, 10)

    def unif(k, shape, bound):
        return jax.random.uniform(k, shape, jnp.float32, -bound, bound)

    b_first = 1.0 / jnp.sqrt(n_embed * n_hidden)
    b_hidden = 1.0 / jnp.sqrt(n_hidden * n_hidden)
    b_output = 1.0 / jnp.sqrt(n_hidden * n_output)

    first_weights_main = unif(ks[0], (n_features, n_embed, n_hidden), b_first)
    first_biases_main = unif(ks[1], (n_features, n_hidden), b_first)
    hidden_weights_main = unif(ks[2], (n_features, n_hidden, n_hidden), b_hidden)
    hidden_biases_main = unif(ks[3], (n_features, n_hidden), b_hidden)
    output_weights_main = unif(ks[4], (n_features, n_hidden, n_output), b_output)
    output_biases_main = unif(ks[5], (n_features, n_output), b_output)
    z_main = jax.random.uniform(ks[6], (n_features,), jnp.float32,
                                -gamma / 100.0, gamma / 100.0)
    embedding = jax.random.normal(ks[7], (total_feature_size, n_embed),
                                  jnp.float32)

    z_smooth = get_smooth_z(z_main, gamma)

    def full_forward(mains_idx, compute_dtype, batch_tile):
        x_emb = embed_mains(mains_idx, embedding, feature_offsets,
                            feature_sizes_arr, total_feature_size,
                            kernel_size, kernel_weight)
        return nam_forward_pallas(
            x_emb, first_weights_main, first_biases_main,
            hidden_weights_main, hidden_biases_main,
            output_weights_main, output_biases_main, z_smooth,
            compute_dtype=compute_dtype, batch_tile=batch_tile)

    # --- small batch, f32 path: tight check against the f32 reference --------
    u = jax.random.uniform(ks[8], (batch, n_features))
    mains = jnp.floor(u * feature_sizes_arr.astype(jnp.float32)).astype(jnp.int32)

    x_emb = embed_mains(mains, embedding, feature_offsets, feature_sizes_arr,
                        total_feature_size, kernel_size, kernel_weight)
    ref = nam_forward_reference(x_emb, first_weights_main, first_biases_main,
                                hidden_weights_main, hidden_biases_main,
                                output_weights_main, output_biases_main,
                                z_smooth)

    out_f32 = jax.block_until_ready(
        full_forward(mains, jnp.float32, 4096))
    assert out_f32.shape == (batch, n_output)
    assert jnp.allclose(out_f32, ref, atol=1e-5, rtol=1e-5), (out_f32, ref)

    # --- bf16 path (default), relaxed tolerance --------------------------------
    out_bf16 = jax.block_until_ready(
        full_forward(mains, jnp.bfloat16, 4096))
    assert out_bf16.shape == (batch, n_output)
    assert jnp.allclose(out_bf16, ref, atol=2e-2, rtol=2e-2), (out_bf16, ref)

    # --- larger batch, multi-step grid (exercises batch tiling + padding), jitted
    batch_big = 300
    u2 = jax.random.uniform(ks[9], (batch_big, n_features))
    mains_big = jnp.floor(
        u2 * feature_sizes_arr.astype(jnp.float32)).astype(jnp.int32)

    x_emb_big = embed_mains(mains_big, embedding, feature_offsets,
                            feature_sizes_arr, total_feature_size,
                            kernel_size, kernel_weight)
    ref_big = nam_forward_reference(x_emb_big, first_weights_main,
                                    first_biases_main, hidden_weights_main,
                                    hidden_biases_main, output_weights_main,
                                    output_biases_main, z_smooth)

    run_big = jax.jit(functools.partial(full_forward,
                                        compute_dtype=jnp.bfloat16,
                                        batch_tile=128))
    out_big = jax.block_until_ready(run_big(mains_big))
    assert out_big.shape == (batch_big, n_output)
    assert jnp.allclose(out_big, ref_big, atol=2e-2, rtol=2e-2), (out_big, ref_big)

    print("KERNEL_OK")
</pallas_src>

<mosaic_0001>
module attributes {stable_mosaic.version = 11 : i64} {
  func.func @nam_packed_kernel(%arg0: i32, %arg1: memref<8x32xf32, #tpu.memory_space<vmem>>, %arg2: memref<32x128xf32, #tpu.memory_space<vmem>>, %arg3: memref<1x128xf32, #tpu.memory_space<vmem>>, %arg4: memref<128x128xf32, #tpu.memory_space<vmem>>, %arg5: memref<1x128xf32, #tpu.memory_space<vmem>>, %arg6: memref<1x128xf32, #tpu.memory_space<vmem>>, %arg7: memref<1x1xf32, #tpu.memory_space<vmem>>, %arg8: memref<1x8xf32, #tpu.memory_space<vmem>>) attributes {dimension_semantics = [#tpu.dimension_semantics<parallel>], iteration_bounds = array<i64: 1>, scalar_prefetch = 0 : i64, scratch_operands = 0 : i64, tpu.core_type = #tpu.core_type<tc>, window_params = [{transform_indices = @transform_0, window_bounds = array<i64: 8, 32>}, {pipeline_mode = #tpu.pipeline_mode<synchronous>, transform_indices = @transform_1, window_bounds = array<i64: 32, 128>}, {pipeline_mode = #tpu.pipeline_mode<synchronous>, transform_indices = @transform_2, window_bounds = array<i64: 1, 128>}, {pipeline_mode = #tpu.pipeline_mode<synchronous>, transform_indices = @transform_3, window_bounds = array<i64: 128, 128>}, {pipeline_mode = #tpu.pipeline_mode<synchronous>, transform_indices = @transform_4, window_bounds = array<i64: 1, 128>}, {pipeline_mode = #tpu.pipeline_mode<synchronous>, transform_indices = @transform_5, window_bounds = array<i64: 1, 128>}, {pipeline_mode = #tpu.pipeline_mode<synchronous>, transform_indices = @transform_6, window_bounds = array<i64: 1, 1>}, {transform_indices = @transform_7, window_bounds = array<i64: 1, 8>}]} {
    %c0 = arith.constant 0 : index
    %c0_0 = arith.constant 0 : index
    %0 = vector.load %arg1[%c0, %c0_0] : memref<8x32xf32, #tpu.memory_space<vmem>>, vector<8x32xf32>
    %c0_1 = arith.constant 0 : index
    %c0_2 = arith.constant 0 : index
    %1 = vector.load %arg2[%c0_1, %c0_2] : memref<32x128xf32, #tpu.memory_space<vmem>>, vector<32x128xf32>
    %cst = arith.constant dense<0.000000e+00> : vector<8x128xf32>
    %2 = tpu.matmul %0, %1, %cst {dimension_numbers = #tpu.dot_dimension_numbers<[1], [0], [0], [1], [0, 0, 1, 1], [], []>} : vector<8x32xf32>, vector<32x128xf32>, vector<8x128xf32> -> vector<8x128xf32>
    %c0_3 = arith.constant 0 : index
    %c0_4 = arith.constant 0 : index
    %3 = vector.load %arg3[%c0_3, %c0_4] : memref<1x128xf32, #tpu.memory_space<vmem>>, vector<1x128xf32>
    %4 = vector.broadcast %3 : vector<1x128xf32> to vector<8x128xf32>
    %5 = arith.addf %2, %4 : vector<8x128xf32>
    %cst_5 = arith.constant 0.000000e+00 : f32
    %6 = vector.broadcast %cst_5 : f32 to vector<8x128xf32>
    %7 = arith.maximumf %5, %6 : vector<8x128xf32>
    %c0_6 = arith.constant 0 : index
    %c0_7 = arith.constant 0 : index
    %8 = vector.load %arg4[%c0_6, %c0_7] : memref<128x128xf32, #tpu.memory_space<vmem>>, vector<128x128xf32>
    %cst_8 = arith.constant dense<0.000000e+00> : vector<8x128xf32>
    %9 = tpu.matmul %7, %8, %cst_8 {dimension_numbers = #tpu.dot_dimension_numbers<[1], [0], [0], [1], [0, 0, 1, 1], [], []>} : vector<8x128xf32>, vector<128x128xf32>, vector<8x128xf32> -> vector<8x128xf32>
    %c0_9 = arith.constant 0 : index
    %c0_10 = arith.constant 0 : index
    %10 = vector.load %arg5[%c0_9, %c0_10] : memref<1x128xf32, #tpu.memory_space<vmem>>, vector<1x128xf32>
    %11 = vector.broadcast %10 : vector<1x128xf32> to vector<8x128xf32>
    %12 = arith.addf %9, %11 : vector<8x128xf32>
    %cst_11 = arith.constant 0.000000e+00 : f32
    %13 = vector.broadcast %cst_11 : f32 to vector<8x128xf32>
    %14 = arith.maximumf %12, %13 : vector<8x128xf32>
    %c0_12 = arith.constant 0 : index
    %c0_13 = arith.constant 0 : index
    %15 = vector.load %arg6[%c0_12, %c0_13] : memref<1x128xf32, #tpu.memory_space<vmem>>, vector<1x128xf32>
    %cst_14 = arith.constant dense<0.000000e+00> : vector<1x8xf32>
    %16 = tpu.matmul %15, %14, %cst_14 {dimension_numbers = #tpu.dot_dimension_numbers<[1], [1], [0], [0], [0, 0, 1, 0], [], []>} : vector<1x128xf32>, vector<8x128xf32>, vector<1x8xf32> -> vector<1x8xf32>
    %c0_15 = arith.constant 0 : index
    %c0_16 = arith.constant 0 : index
    %17 = vector.load %arg7[%c0_15, %c0_16] : memref<1x1xf32, #tpu.memory_space<vmem>>, vector<1x1xf32>
    %18 = vector.broadcast %17 : vector<1x1xf32> to vector<1x8xf32>
    %19 = arith.addf %16, %18 : vector<1x8xf32>
    %c0_17 = arith.constant 0 : index
    %c0_18 = arith.constant 0 : index
    %20 = vector.load %arg8[%c0_17, %c0_18] : memref<1x8xf32, #tpu.memory_space<vmem>>, vector<1x8xf32>
    tpu.vector_store %arg8[%c0_17, %c0_18], %19 {strides = array<i32>} : memref<1x8xf32, #tpu.memory_space<vmem>>, vector<1x8xf32>,
    return
  }
  func.func @transform_0(%arg0: i32) -> (i32, i32) {
    %c0_i32 = arith.constant 0 : i32
    %c0_i32_0 = arith.constant 0 : i32
    return %arg0, %c0_i32 : i32, i32
  }
  func.func @transform_1(%arg0: i32) -> (i32, i32) {
    %c0_i32 = arith.constant 0 : i32
    %c0_i32_0 = arith.constant 0 : i32
    %c0_i32_1 = arith.constant 0 : i32
    return %c0_i32, %c0_i32_0 : i32, i32
  }
  func.func @transform_2(%arg0: i32) -> (i32, i32) {
    %c0_i32 = arith.constant 0 : i32
    %c0_i32_0 = arith.constant 0 : i32
    %c0_i32_1 = arith.constant 0 : i32
    return %c0_i32, %c0_i32_0 : i32, i32
  }
  func.func @transform_3(%arg0: i32) -> (i32, i32) {
    %c0_i32 = arith.constant 0 : i32
    %c0_i32_0 = arith.constant 0 : i32
    %c0_i32_1 = arith.constant 0 : i32
    return %c0_i32, %c0_i32_0 : i32, i32
  }
  func.func @transform_4(%arg0: i32) -> (i32, i32) {
    %c0_i32 = arith.constant 0 : i32
    %c0_i32_0 = arith.constant 0 : i32
    %c0_i32_1 = arith.constant 0 : i32
    return %c0_i32, %c0_i32_0 : i32, i32
  }
  func.func @transform_5(%arg0: i32) -> (i32, i32) {
    %c0_i32 = arith.constant 0 : i32
    %c0_i32_0 = arith.constant 0 : i32
    %c0_i32_1 = arith.constant 0 : i32
    return %c0_i32, %c0_i32_0 : i32, i32
  }
  func.func @transform_6(%arg0: i32) -> (i32, i32) {
    %c0_i32 = arith.constant 0 : i32
    %c0_i32_0 = arith.constant 0 : i32
    %c0_i32_1 = arith.constant 0 : i32
    return %c0_i32, %c0_i32_0 : i32, i32
  }
  func.func @transform_7(%arg0: i32) -> (i32, i32) {
    %c0_i32 = arith.constant 0 : i32
    %c0_i32_0 = arith.constant 0 : i32
    return %c0_i32, %arg0 : i32, i32
  }
}

</mosaic_0001>

<bundles_post_ra>
// kernel: tpu_custom_call.1
= control target key start
LH: loop header
LB: loop body
LE: loop exit
PB: predicated region body
PF: predicated region fallthrough
CT: control target
= control target key end

     0   :  { %s622_s0 = inlined_call_operand.hbm [shape: f32[8,32], index: 0, kind: input, shape index: {}]   ;;  %s623_s1 = inlined_call_operand.hbm [shape: f32[32,128], index: 1, kind: input, shape index: {}]   ;;  %s624_s2 = inlined_call_operand.vmem [shape: f32[1,128], index: 2, kind: input, shape index: {}]   ;;  %s625_s3 = inlined_call_operand.hbm [shape: f32[128,128], index: 3, kind: input, shape index: {}]   ;;  %s626_s4 = inlined_call_operand.vmem [shape: f32[1,128], index: 4, kind: input, shape index: {}]   ;;  %s627_s5 = inlined_call_operand.vmem [shape: f32[1,128], index: 5, kind: input, shape index: {}]   ;;  %s628_s6 = inlined_call_operand.<no memory space> [shape: f32[1,1], index: 6, kind: input, shape index: {}]   ;;  %s629_s7 = inlined_call_operand.hbm [shape: f32[1,8], index: 7, kind: output, shape index: {}]  }
   0x1   :  { %v12_v0 = vstv %s628_s6 }
   0x2   :  { %13 = vst [vmem:[#allocation2] sm:$0x1] %v12_v0 }
   0x3   :  { %14 = vsyncpa [#allocation4], 0 }
   0x4   :  { %15 = vsyncpa [#allocation7], 0 }
   0x5   :  { %16 = vsyncpa [#allocation5], 0  ;;  %s522_s26 = smov [#allocation6]  }
   0x6   :  { %s32_s27 = sshll.u32 %s522_s26, 4  ;;  %s33_s27 = int_to_ptr.vmem [resolvable:$true] %s32_s27 }
   0x7   :  { %s444_s28 = scalar_lea.vmem %s33_s27, 512  ;;  %p449_p1 = scmp.lt.s32.totalorder %s33_s27, %s33_s27 }
   0x8   :  { %p445_p0 = scmp.ne.s32.totalorder %s33_s27, %s444_s28  ;;  %p450_p2 = scmp.lt.s32.totalorder %s444_s28, %s444_s28 }
   0xa   :  { %p451_p3 = por %p450_p2, %p449_p1 }
   0xc   :  { %p452_p4 = pnand %p451_p3, %p445_p0 }
   0xe   :  { %455 = shalt.err (!%p452_p4)
}
   0xf   :  { %s523_s29 = smov 128   ;;  %s524_s30 = smov 8  }
  0x10   :  { %38 = dma.hbm_to_vmem [thread:$0]  %s623_s1, 512, %s33_s27, [#allocation7], %s523_s29, %s523_s29, %s524_s30  }
  0x11   :  { %s525_s6 = smov [#allocation3]   ;;  %s526_s11 = smov [#allocation8]  }
  0x12   :  { %s23_s10 = sshll.u32 %s525_s6, 4  ;;  %s46_s12 = sshll.u32 %s526_s11, 4  ;;  %s24_s10 = int_to_ptr.vmem [resolvable:$true] %s23_s10  ;;  %s47_s12 = int_to_ptr.vmem [resolvable:$true] %s46_s12 }
  0x13   :  { %s464_s13 = scalar_lea.vmem %s24_s10, 128  ;;  %p469_p6 = scmp.lt.s32.totalorder %s24_s10, %s24_s10 }
  0x14   :  { %p465_p5 = scmp.ne.s32.totalorder %s24_s10, %s464_s13  ;;  %p470_p7 = scmp.lt.s32.totalorder %s464_s13, %s464_s13 }
  0x16   :  { %p471_p8 = por %p470_p7, %p469_p6 }
  0x18   :  { %p472_p9 = pnand %p471_p8, %p465_p5 }
  0x1a   :  { %475 = shalt.err (!%p472_p9)
}
  0x1b   :  { %26 = dma.hbm_to_vmem [thread:$0]  %s622_s0, 128, %s24_s10, [#allocation4]  }
  0x1c   :  { %s484_s16 = scalar_lea.vmem %s47_s12, 2048  ;;  %p489_p11 = scmp.lt.s32.totalorder %s47_s12, %s47_s12 }
  0x1d   :  { %p485_p10 = scmp.ne.s32.totalorder %s47_s12, %s484_s16  ;;  %p490_p12 = scmp.lt.s32.totalorder %s484_s16, %s484_s16 }
  0x1f   :  { %p491_p13 = por %p490_p12, %p489_p11 }
  0x21   :  { %p492_p0 = pnand %p491_p13, %p485_p10 }
  0x23   :  { %495 = shalt.err (!%p492_p0)
}
  0x24   :  { %52 = dma.hbm_to_vmem [thread:$0]  %s625_s3, 2048, %s47_s12, [#allocation7], %s523_s29, %s523_s29, %s524_s30  }
  0x25   :  { %516 = dma.done.wait [#allocation4], 128  }
  0x26   :  { %517 = vsyncadd [#allocation4], 4294967168 }
  0x27   :  { %518 = dma.done.wait [#allocation7], 2560  }
  0x28   :  { %519 = vsyncadd [#allocation7], 4294964736  ;;  %v527_v1 = vmov 0.0   ;;  %vm528_vm0 = vmmov 0   ;;  %v72_v2 = vld [vmem:[#allocation6 + $0x18] sm:$0xff]  ;;  %v71_v3 = vld [vmem:[#allocation6 + $0x10] sm:$0xff]  ;;  %v256_v36 = vlaneseq }
  0x29   :  { %375 = vmatprep.subr.mxu0 %v527_v1  ;;  %383 = vmatprep.mubr.msk.f32.mxu0 %vm528_vm0, %v527_v1  ;;  %v170_v4 = vld [vmem:[#allocation8 + $0x78] sm:$0xff]  ;;  %v70_v5 = vld [vmem:[#allocation6 + $0x8] sm:$0xff]  ;;  %v169_v6 = vld [vmem:[#allocation8 + $0x70] sm:$0xff]  ;;  %vm80_vm1 = vcmask 261120   ;;  %v529_v29 = vmov 0   ;;  %s530_s21 = smov [#allocation9]  }
  0x2a   :  { %386 = vmatprep.subr.mxu1 %v527_v1  ;;  %418 = vmatprep.mubr.msk.f32.mxu1 %vm528_vm0, %v527_v1  ;;  %v168_v7 = vld [vmem:[#allocation8 + $0x68] sm:$0xff]  ;;  %v69_v8 = vld [vmem:[#allocation6] sm:$0xff]  ;;  %v68_v9 = vld [vmem:[#allocation3] sm:$0xff]  ;;  %v257_v37 = vshrl.u32 %v256_v36, 7  ;;  %s338_s22 = sshll.u32 %s530_s21, 4  ;;  %vm330_vm2 = vcmask 57344   ;;  %s339_s22 = int_to_ptr.vmem [resolvable:$true] %s338_s22 }
  0x2b   :  { %376 = vmatpush3.msra.mxu0 %v72_v2  ;;  %387 = vmatpush3.msra.mxu1 %v170_v4  ;;  %v167_v10 = vld [vmem:[#allocation8 + $0x60] sm:$0xff]  ;;  %v166_v11 = vld [vmem:[#allocation8 + $0x58] sm:$0xff]  ;;  %v165_v12 = vld [vmem:[#allocation8 + $0x50] sm:$0xff]  ;;  %s500_s23 = scalar_lea.vmem %s339_s22, 32  ;;  %p501_p2 = scmp.lt.s32.totalorder %s339_s22, %s339_s22 }
  0x2c   :  { %377 = vmatprep.subr.mxu0 %v527_v1  ;;  %388 = vmatprep.subr.mxu1 %v527_v1  ;;  %v164_v13 = vld [vmem:[#allocation8 + $0x48] sm:$0xff]  ;;  %v163_v14 = vld [vmem:[#allocation8 + $0x40] sm:$0xff]  ;;  %v162_v15 = vld [vmem:[#allocation8 + $0x38] sm:$0xff]  ;;  %v258_v38 = vsub.s32 0, %v257_v37 }
  0x2d   :  { %378 = vmatpush3.msra.mxu0 %v71_v3  ;;  %389 = vmatpush3.msra.mxu1 %v169_v6  ;;  %v161_v16 = vld [vmem:[#allocation8 + $0x30] sm:$0xff]  ;;  %v160_v17 = vld [vmem:[#allocation8 + $0x28] sm:$0xff]  ;;  %v159_v18 = vld [vmem:[#allocation8 + $0x20] sm:$0xff] }
  0x2e   :  { %379 = vmatprep.subr.mxu0 %v527_v1  ;;  %390 = vmatprep.subr.mxu1 %v527_v1  ;;  %v158_v19 = vld [vmem:[#allocation8 + $0x18] sm:$0xff]  ;;  %v157_v20 = vld [vmem:[#allocation8 + $0x10] sm:$0xff]  ;;  %v156_v21 = vld [vmem:[#allocation8 + $0x8] sm:$0xff] }
  0x2f   :  { %380 = vmatpush3.msra.mxu0 %v70_v5  ;;  %391 = vmatpush3.msra.mxu1 %v168_v7  ;;  %v155_v22 = vld [vmem:[#allocation8] sm:$0xff]  ;;  %v348_v23 = vld [vmem:[%s624_s2] ss:$0 sm:$0xff] }
  0x30   :  { %381 = vmatprep.subr.mxu0 %v527_v1  ;;  %392 = vmatprep.subr.mxu1 %v527_v1  ;;  %v250_v28 = vld [vmem:[#allocation2] sm:$0x1] }
  0x31   :  { %382 = vmatpush3.msra.mxu0 %v69_v8  ;;  %393 = vmatpush3.msra.mxu1 %v167_v10  ;;  %v350_v30 = vld [vmem:[%s626_s4] ss:$0 sm:$0xff]  ;;  %s496_s4 = scalar_lea.vmem %s339_s22, 16 }
  0x32   :  { %384 = vmatmul.mubr.msk.f32.vlgmr.msra.gmra.mxu0 %vm80_vm1, %v68_v9  ;;  %394 = vmatprep.subr.mxu1 %v527_v1  ;;  %v249_v35 = vld [vmem:[%s627_s5] sm:$0x1]  ;;  %p497_p1 = scmp.ne.s32.totalorder %s339_s22, %s496_s4  ;;  %p502_p3 = scmp.lt.s32.totalorder %s500_s23, %s496_s4 }
  0x33   :  { %421 = vmatprep.subr.mxu0 %v527_v1  ;;  %395 = vmatpush3.msra.mxu1 %v166_v11 }
  0x34   :  { %423 = vmatprep.mubr.msk.f32.mxu0 %vm528_vm0, %v527_v1  ;;  %396 = vmatprep.subr.mxu1 %v527_v1  ;;  %p503_p4 = por %p502_p3, %p501_p2 }
  0x35   :  { %397 = vmatpush3.msra.mxu1 %v165_v12  ;;  %435 = vset.pattern.permute.xlu0 %v529_v29 }
  0x36   :  { %398 = vmatprep.subr.mxu1 %v527_v1  ;;  %253 = vperm.xlu0 %435, %v250_v28   ;;  %p504_p5 = pnand %p503_p4, %p497_p1 }
  0x37   :  { %399 = vmatpush3.msra.mxu1 %v164_v13 }
  0x38   :  { %400 = vmatprep.subr.mxu1 %v527_v1 }
  0x39   :  { %401 = vmatpush3.msra.mxu1 %v163_v14 }
  0x3a   :  { %402 = vmatprep.subr.mxu1 %v527_v1 }
  0x3b   :  { %403 = vmatpush3.msra.mxu1 %v162_v15 }
  0x3c   :  { %404 = vmatprep.subr.mxu1 %v527_v1 }
  0x3d   :  { %405 = vmatpush3.msra.mxu1 %v161_v16 }
  0x3e   :  { %406 = vmatprep.subr.mxu1 %v527_v1 }
  0x3f   :  { %407 = vmatpush3.msra.mxu1 %v160_v17 }
  0x40   :  { %408 = vmatprep.subr.mxu1 %v527_v1 }
  0x41   :  { %409 = vmatpush3.msra.mxu1 %v159_v18 }
  0x42   :  { %410 = vmatprep.subr.mxu1 %v527_v1 }
  0x43   :  { %411 = vmatpush3.msra.mxu1 %v158_v19 }
  0x44   :  { %412 = vmatprep.subr.mxu1 %v527_v1 }
  0x45   :  { %413 = vmatpush3.msra.mxu1 %v157_v20 }
  0x46   :  { %414 = vmatprep.subr.mxu1 %v527_v1 }
  0x47   :  { %415 = vmatpush3.msra.mxu1 %v156_v21 }
  0x48   :  { %416 = vmatprep.subr.mxu1 %v527_v1 }
  0x49   :  { %417 = vmatpush3.msra.mxu1 %v155_v22 }
  0xb1   :  { %v254_v39 = vpop.permute.xlu0 %253 }
  0xb2   :  { %v259_v40 = vrot.slane %v254_v39, %v258_v38 }
  0xf2   :  { %v150_v24 = vpop.f32.mrf.mxu0 }
  0xf3   :  { %v151_v25 = vadd.f32 %v348_v23, %v150_v24 }
  0xf4   :  { %v385_v26 = vpop.f32.mrf.mxu0 }
  0xf5   :  { %v154_v27 = vmax.f32 %v151_v25, 0.0 }
  0xf7   :  { %419 = vmatmul.mubr.f32.vlgmr.msra.gmra.mxu1 %v154_v27 }
 0x1b7   :  { %v244_v31 = vpop.f32.mrf.mxu1 }
 0x1b8   :  { %v245_v32 = vadd.f32 %v350_v30, %v244_v31 }
 0x1b9   :  { %v420_v33 = vpop.f32.mrf.mxu1 }
 0x1ba   :  { %v248_v34 = vmax.f32 %v245_v32, 0.0 }
 0x1bc   :  { %422 = vmatpush3.xpose.msra.mxu0 %v248_v34 }
 0x1bf   :  { %424 = vmatmul.mubr.f32.vlgmr.msra.gmra.mxu0 %v249_v35 }
 0x27f   :  { %v326_v41 = vpop.f32.mrf.mxu0 }
 0x280   :  { %v327_v42 = vadd.f32 %v326_v41, %v259_v40 }
 0x281   :  { %v425_v43 = vpop.f32.mrf.mxu0 }
 0x282   :  { %331 = vst.msk [vmem:[#allocation9] sm:$0x1] %vm330_vm2, %v327_v42 }
 0x283   :  { %507 = shalt.err (!%p504_p5)
}
 0x284   :  { %341 = dma.vmem_to_hbm [thread:$0]  %s339_s22, 16, %s629_s7, [#allocation5]  }
 0x285   :  { %520 = dma.done.wait [#allocation5], 16  }
 0x286   :  { %521 = vsyncadd [#allocation5], 4294967280 }
 0x287   :  { %345 = vsyncpa [#allocation4], 1 }
 0x288   :  { %346 = vsyncpa [#allocation7], 1 }
 0x289   :  { %347 = vsyncpa [#allocation5], 1 }

</bundles_post_ra>
